<compile_context>
chip_gen: v7x
topology: tpu7x:2x2x1
jax: 0.10.0
libtpu: 0.0.40
codegen_flags: <defaults>
</compile_context>

<pallas_src>
import functools

import jax
import jax.numpy as jnp
from jax import lax
from jax.experimental import pallas as pl
from jax.experimental.pallas import tpu as pltpu


# ----------------------------- kernel helpers ------------------------------ #

def _softmax_rows(x):
    """Softmax over the last axis; f32 in/out, reciprocal on the EUP."""
    m = jnp.max(x, axis=-1, keepdims=True)
    e = jnp.exp(x - m)
    return e * pl.reciprocal(jnp.sum(e, axis=-1, keepdims=True), approx=True)


# --------------------------- Kernel A: scoring ------------------------------ #

def _score_kernel(a_ref, r_ref, out_ref, *, Lq):
    # Cosine-similarity sentence scoring (GAReader.sentences_select).
    # r = [q ; o0..o4] concatenated along tokens, so one matmul covers both
    # the "pq" and "po" inner products.
    Ns, Ls, D = a_ref.shape[1], a_ref.shape[2], a_ref.shape[3]
    Lc = r_ref.shape[1]
    f32, bf16 = jnp.float32, jnp.bfloat16

    a = a_ref[0].reshape(Ns * Ls, D)                      # (Ns*Ls, D)
    r = r_ref[0]                                          # (Lc, D)

    # reference denominator is sqrt(||a|| * ||r||)  ->  pre-scale rows by ||.||^-1/2
    a_sc = a * lax.rsqrt(jnp.sqrt(jnp.sum(a * a, axis=-1, keepdims=True)))
    r_sc = r * lax.rsqrt(jnp.sqrt(jnp.sum(r * r, axis=-1, keepdims=True)))

    cos = lax.dot_general(a_sc.astype(bf16), r_sc.astype(bf16),
                          (((1,), (1,)), ((), ())),
                          preferred_element_type=f32)     # (Ns*Ls, Lc)

    mx = jnp.max(cos.reshape(Ns, Ls, Lc), axis=1)         # (Ns, Lc)
    score_q = jnp.sum(mx[:, :Lq], axis=-1, keepdims=True) * (1.0 / Lq)
    score_o = jnp.sum(mx[:, Lq:], axis=-1, keepdims=True) * (1.0 / (Lc - Lq))
    out_ref[0] = score_q + score_o                        # (Ns, 1)


def sentence_scores(a_emb, qo_cat, Lq):
    B, Ns, Ls, D = a_emb.shape
    Lc = qo_cat.shape[1]
    out = pl.pallas_call(
        functools.partial(_score_kernel, Lq=Lq),
        out_shape=jax.ShapeDtypeStruct((B, Ns, 1), jnp.float32),
        grid=(B,),
        in_specs=[pl.BlockSpec((1, Ns, Ls, D), lambda b: (b, 0, 0, 0)),
                  pl.BlockSpec((1, Lc, D), lambda b: (b, 0, 0))],
        out_specs=pl.BlockSpec((1, Ns, 1), lambda b: (b, 0, 0)),
        compiler_params=pltpu.CompilerParams(dimension_semantics=("parallel",)),
    )(a_emb, qo_cat)
    return out[:, :, 0]                                   # (B, Ns)


# ------------------- Kernel B: fused OO + BiMatching + final ---------------- #

def _fused_kernel(s_ref, q_ref, o_ref, w_ref, b_ref, out_ref):
    n_opt, Lo, D = o_ref.shape[1], o_ref.shape[2], o_ref.shape[3]
    Lt = s_ref.shape[1]
    f32, bf16 = jnp.float32, jnp.bfloat16

    s_o = s_ref[0]                                        # (Lt, D)  selected sentences
    q = q_ref[0]                                          # (Lq, D)
    o3 = o_ref[0]                                         # (5, Lo, D)
    o_flat = o3.reshape(n_opt * Lo, D)                    # (40, D)

    s_bf = s_o.astype(bf16)
    q_bf = q.astype(bf16)
    o_bf = o_flat.astype(bf16)

    # ---- OO interaction: one (40,D)x(D,40) score matmul for all 5 options ----
    S_oo = lax.dot_general(o_bf, o_bf, (((1,), (1,)), ((), ())),
                           preferred_element_type=f32)    # (40, 40)
    row_id = lax.broadcasted_iota(jnp.int32, (n_opt * Lo, Lo), 0)
    att_oo = jnp.zeros((n_opt * Lo, D), f32)
    for k in range(n_opt):
        p_k = _softmax_rows(S_oo[:, k * Lo:(k + 1) * Lo])         # (40, Lo)
        self_rows = (row_id >= k * Lo) & (row_id < (k + 1) * Lo)  # drop self block
        p_k = jnp.where(self_rows, 0.0, p_k)
        att_oo = att_oo + lax.dot_general(
            p_k.astype(bf16), o3[k].astype(bf16), (((1,), (0,)), ((), ())),
            preferred_element_type=f32)                   # (40, D)
    o_new = o_flat * (att_oo * (1.0 / (n_opt - 1)))       # (40, D) gated options
    o_new_bf = o_new.astype(bf16)
    o_new3 = o_new.reshape(n_opt, Lo, D)

    # ---- BiMatching scores: two big matmuls (all 5 options at once; q once) ----
    S_ao = lax.dot_general(s_bf, o_new_bf, (((1,), (1,)), ((), ())),
                           preferred_element_type=f32)    # (Lt, 40)
    S_qa = lax.dot_general(s_bf, q_bf, (((1,), (1,)), ((), ())),
                           preferred_element_type=f32)    # (Lt, Lq)

    # qa: loop-invariant across options, computed once.
    p_qa = _softmax_rows(S_qa)
    att_qa = lax.dot_general(p_qa.astype(bf16), q_bf, (((1,), (0,)), ((), ())),
                             preferred_element_type=f32)  # (Lt, D)
    qa_vec = jnp.mean(s_o * att_qa, axis=0, keepdims=True)          # (1, D)

    # ao_i: per-option softmax slices, one batched attention matmul.
    p_ao = jnp.stack([_softmax_rows(S_ao[:, k * Lo:(k + 1) * Lo])
                      for k in range(n_opt)], axis=0)                # (5, Lt, Lo)
    att_ao = lax.dot_general(p_ao.astype(bf16), o_new3.astype(bf16),
                             (((2,), (1,)), ((0,), (0,))),
                             preferred_element_type=f32)             # (5, Lt, D)
    ao_vec = jnp.mean(s_o[None, :, :] * att_ao, axis=1)              # (5, D)

    # qo_i: all 5 options in one (40,D)x(D,Lq) matmul.
    S_qo = lax.dot_general(o_new_bf, q_bf, (((1,), (1,)), ((), ())),
                           preferred_element_type=f32)    # (40, Lq)
    p_qo = _softmax_rows(S_qo)
    att_qo = lax.dot_general(p_qo.astype(bf16), q_bf, (((1,), (0,)), ((), ())),
                             preferred_element_type=f32)  # (40, D)
    qo_vec = jnp.mean((o_new * att_qo).reshape(n_opt, Lo, D), axis=1)  # (5, D)

    # ---- final linear (3D -> 1) + softmax over the 5 options (lane-dense) ----
    w = w_ref[...]                                        # (1, 3D)
    w_ao, w_qa, w_qo = w[:, :D], w[:, D:2 * D], w[:, 2 * D:]
    logits = (lax.dot_general(w_ao, ao_vec, (((1,), (1,)), ((), ())),
                              preferred_element_type=f32)
              + lax.dot_general(w_qo, qo_vec, (((1,), (1,)), ((), ())),
                                preferred_element_type=f32)
              + jnp.sum(qa_vec * w_qa)
              + b_ref[0, 0])                              # (1, 5)
    m = jnp.max(logits, axis=-1, keepdims=True)
    e = jnp.exp(logits - m)
    out_ref[0] = e / jnp.sum(e, axis=-1, keepdims=True)   # exact final softmax


def fused_options(sentences_o, q_emb, o_all, w, b):
    B, Lt, D = sentences_o.shape
    n_opt, Lo = o_all.shape[1], o_all.shape[2]
    Lq = q_emb.shape[1]
    out = pl.pallas_call(
        _fused_kernel,
        out_shape=jax.ShapeDtypeStruct((B, 1, n_opt), jnp.float32),
        grid=(B,),
        in_specs=[pl.BlockSpec((1, Lt, D), lambda b: (b, 0, 0)),
                  pl.BlockSpec((1, Lq, D), lambda b: (b, 0, 0)),
                  pl.BlockSpec((1, n_opt, Lo, D), lambda b: (b, 0, 0, 0)),
                  pl.BlockSpec((1, 3 * D), lambda b: (0, 0)),
                  pl.BlockSpec((1, 1), lambda b: (0, 0))],
        out_specs=pl.BlockSpec((1, 1, n_opt), lambda b: (b, 0, 0)),
        compiler_params=pltpu.CompilerParams(dimension_semantics=("parallel",)),
    )(sentences_o, q_emb, o_all, w, b)
    return out[:, 0, :]                                   # (B, 5)


# --------------------------------- forward --------------------------------- #

def gareader_forward(params, batch, top_k=5):
    o_ids = batch[0:5]
    q_ids, a_len, a_ids = batch[5], batch[6], batch[7]
    del a_len  # unused in the torch forward as well

    emb = lambda ids: jnp.take(params["emb"], ids, axis=0)

    o_embs = [emb(ids) for ids in o_ids]                  # 5 x (B, Lo, D)
    q_emb = emb(q_ids)                                    # (B, Lq, D)
    # a_ids is [B, Ls, Ns]; per-batch transpose(0,1) before embedding as in torch.
    a_emb = emb(jnp.transpose(a_ids, (0, 2, 1)))          # (B, Ns, Ls, D)

    B, Ns, Ls, D = a_emb.shape
    o_all = jnp.stack(o_embs, axis=1)                     # (B, 5, Lo, D)
    Lo = o_all.shape[2]
    Lq = q_emb.shape[1]

    # sentences_select: Pallas scoring + batched top-k / sort / gather in XLA. #
    qo_cat = jnp.concatenate([q_emb, o_all.reshape(B, 5 * Lo, D)], axis=1)
    scores = sentence_scores(a_emb, qo_cat, Lq)           # (B, Ns)

    k = min(top_k, Ns)
    _, idx = lax.top_k(scores, k)                         # descending by score
    idx = jnp.sort(idx, axis=-1)                          # ascending index order
    if top_k > k:
        idx = jnp.concatenate(
            [idx, jnp.zeros((B, top_k - k), idx.dtype)], axis=-1)
    sel = jnp.take_along_axis(a_emb, idx[:, :, None, None], axis=1)  # (B,topK,Ls,D)
    sentences_o = sel.reshape(B, top_k * Ls, D)           # (B, topK*Ls, D)

    # OO interaction + BiMatchings + final linear + softmax, fused. #
    return fused_options(sentences_o, q_emb, o_all, params["w"], params["b"])


# ----------------------------------- main ----------------------------------- #

if __name__ == "__main__":
    B = 2          # batch
    D = 128        # embedding_dim
    Lq = 8         # question length
    Lo = 8         # option length
    Ls = 8         # sentence length
    Ns = 8         # sentences per article
    VOCAB = 64
    TOPK = 5

    key = jax.random.PRNGKey(0)
    k_emb, k_w, k_o, k_q, k_a = jax.random.split(key, 5)

    params = {
        "emb": jax.random.normal(k_emb, (VOCAB, D), jnp.float32) * 0.1,
        "w": jax.random.normal(k_w, (1, 3 * D), jnp.float32) * 0.05,
        "b": jnp.zeros((1, 1), jnp.float32),
    }

    o_keys = jax.random.split(k_o, 5)
    o_ids = [jax.random.randint(ok, (B, Lo), 0, VOCAB, dtype=jnp.int32)
             for ok in o_keys]
    q_ids = jax.random.randint(k_q, (B, Lq), 0, VOCAB, dtype=jnp.int32)
    a_ids = jax.random.randint(k_a, (B, Ls, Ns), 0, VOCAB, dtype=jnp.int32)
    a_len = jnp.full((B,), Ns, dtype=jnp.int32)

    batch = (*o_ids, q_ids, a_len, a_ids)

    logit = gareader_forward(params, batch, top_k=TOPK)
    logit = jax.block_until_ready(logit)

    assert logit.shape == (B, 5), logit.shape
    assert bool(jnp.all(jnp.isfinite(logit)))
    assert bool(jnp.allclose(jnp.sum(logit, axis=1), 1.0, atol=1e-5))
    print("KERNEL_OK")
</pallas_src>

<mosaic_0001>
module attributes {stable_mosaic.version = 11 : i64} {
  func.func @_score_kernel(%arg0: i32, %arg1: memref<1x8x8x128xf32, #tpu.memory_space<vmem>>, %arg2: memref<1x48x128xf32, #tpu.memory_space<vmem>>, %arg3: memref<1x8x1xf32, #tpu.memory_space<vmem>>) attributes {dimension_semantics = [#tpu.dimension_semantics<parallel>], iteration_bounds = array<i64: 2>, scalar_prefetch = 0 : i64, scratch_operands = 0 : i64, tpu.core_type = #tpu.core_type<tc>, window_params = [{transform_indices = @transform_0, window_bounds = array<i64: 1, 8, 8, 128>}, {transform_indices = @transform_1, window_bounds = array<i64: 1, 48, 128>}, {transform_indices = @transform_2, window_bounds = array<i64: 1, 8, 1>}]} {
    %c0 = arith.constant 0 : index
    %c0_0 = arith.constant 0 : index
    %c0_1 = arith.constant 0 : index
    %c0_2 = arith.constant 0 : index
    %0 = vector.load %arg1[%c0, %c0_0, %c0_1, %c0_2] : memref<1x8x8x128xf32, #tpu.memory_space<vmem>>, vector<1x8x8x128xf32>
    %1 = vector.shape_cast %0 : vector<1x8x8x128xf32> to vector<8x8x128xf32>
    %2 = vector.shape_cast %1 : vector<8x8x128xf32> to vector<64x128xf32>
    %c0_3 = arith.constant 0 : index
    %c0_4 = arith.constant 0 : index
    %c0_5 = arith.constant 0 : index
    %3 = vector.load %arg2[%c0_3, %c0_4, %c0_5] : memref<1x48x128xf32, #tpu.memory_space<vmem>>, vector<1x48x128xf32>
    %4 = vector.shape_cast %3 : vector<1x48x128xf32> to vector<48x128xf32>
    %5 = arith.mulf %2, %2 : vector<64x128xf32>
    %cst = arith.constant dense<0.000000e+00> : vector<64xf32>
    %6 = vector.multi_reduction <add>, %5, %cst [1] : vector<64x128xf32> to vector<64xf32>
    %7 = vector.shape_cast %6 : vector<64xf32> to vector<64x1xf32>
    %8 = math.sqrt %7 : vector<64x1xf32>
    %9 = math.rsqrt %8 : vector<64x1xf32>
    %10 = vector.broadcast %9 : vector<64x1xf32> to vector<64x128xf32>
    %11 = arith.mulf %2, %10 : vector<64x128xf32>
    %12 = arith.mulf %4, %4 : vector<48x128xf32>
    %cst_6 = arith.constant dense<0.000000e+00> : vector<48xf32>
    %13 = vector.multi_reduction <add>, %12, %cst_6 [1] : vector<48x128xf32> to vector<48xf32>
    %14 = vector.shape_cast %13 : vector<48xf32> to vector<48x1xf32>
    %15 = math.sqrt %14 : vector<48x1xf32>
    %16 = math.rsqrt %15 : vector<48x1xf32>
    %17 = vector.broadcast %16 : vector<48x1xf32> to vector<48x128xf32>
    %18 = arith.mulf %4, %17 : vector<48x128xf32>
    %19 = arith.truncf %11 : vector<64x128xf32> to vector<64x128xbf16>
    %20 = arith.truncf %18 : vector<48x128xf32> to vector<48x128xbf16>
    %cst_7 = arith.constant dense<0.000000e+00> : vector<64x48xf32>
    %21 = tpu.matmul %19, %20, %cst_7 {dimension_numbers = #tpu.dot_dimension_numbers<[1], [1], [0], [0], [0, 0, 1, 0], [], []>} : vector<64x128xbf16>, vector<48x128xbf16>, vector<64x48xf32> -> vector<64x48xf32>
    %22 = vector.shape_cast %21 : vector<64x48xf32> to vector<8x8x48xf32>
    %cst_8 = arith.constant dense<0xFF800000> : vector<8x48xf32>
    %23 = vector.multi_reduction <maximumf>, %22, %cst_8 [1] : vector<8x8x48xf32> to vector<8x48xf32>
    %24 = vector.extract_strided_slice %23 {offsets = [0, 0], sizes = [8, 8], strides = [1, 1]} : vector<8x48xf32> to vector<8x8xf32>
    %cst_9 = arith.constant dense<0.000000e+00> : vector<8xf32>
    %25 = vector.multi_reduction <add>, %24, %cst_9 [1] : vector<8x8xf32> to vector<8xf32>
    %26 = vector.shape_cast %25 : vector<8xf32> to vector<8x1xf32>
    %cst_10 = arith.constant 1.250000e-01 : f32
    %27 = vector.broadcast %cst_10 : f32 to vector<8x1xf32>
    %28 = arith.mulf %26, %27 : vector<8x1xf32>
    %29 = vector.extract_strided_slice %23 {offsets = [0, 8], sizes = [8, 40], strides = [1, 1]} : vector<8x48xf32> to vector<8x40xf32>
    %cst_11 = arith.constant dense<0.000000e+00> : vector<8xf32>
    %30 = vector.multi_reduction <add>, %29, %cst_11 [1] : vector<8x40xf32> to vector<8xf32>
    %31 = vector.shape_cast %30 : vector<8xf32> to vector<8x1xf32>
    %cst_12 = arith.constant 2.500000e-02 : f32
    %32 = vector.broadcast %cst_12 : f32 to vector<8x1xf32>
    %33 = arith.mulf %31, %32 : vector<8x1xf32>
    %34 = arith.addf %28, %33 : vector<8x1xf32>
    %c0_13 = arith.constant 0 : index
    %c0_14 = arith.constant 0 : index
    %c0_15 = arith.constant 0 : index
    %35 = vector.load %arg3[%c0_13, %c0_14, %c0_15] : memref<1x8x1xf32, #tpu.memory_space<vmem>>, vector<1x8x1xf32>
    %36 = vector.shape_cast %35 : vector<1x8x1xf32> to vector<8x1xf32>
    %37 = vector.shape_cast %34 : vector<8x1xf32> to vector<1x8x1xf32>
    tpu.vector_store %arg3[%c0_13, %c0_14, %c0_15], %37 {strides = array<i32>} : memref<1x8x1xf32, #tpu.memory_space<vmem>>, vector<1x8x1xf32>,
    return
  }
  func.func @transform_0(%arg0: i32) -> (i32, i32, i32, i32) {
    %c0_i32 = arith.constant 0 : i32
    %c0_i32_0 = arith.constant 0 : i32
    %c0_i32_1 = arith.constant 0 : i32
    %c0_i32_2 = arith.constant 0 : i32
    return %arg0, %c0_i32, %c0_i32_0, %c0_i32_1 : i32, i32, i32, i32
  }
  func.func @transform_1(%arg0: i32) -> (i32, i32, i32) {
    %c0_i32 = arith.constant 0 : i32
    %c0_i32_0 = arith.constant 0 : i32
    %c0_i32_1 = arith.constant 0 : i32
    return %arg0, %c0_i32, %c0_i32_0 : i32, i32, i32
  }
  func.func @transform_2(%arg0: i32) -> (i32, i32, i32) {
    %c0_i32 = arith.constant 0 : i32
    %c0_i32_0 = arith.constant 0 : i32
    %c0_i32_1 = arith.constant 0 : i32
    return %arg0, %c0_i32, %c0_i32_0 : i32, i32, i32
  }
}

</mosaic_0001>

<bundles_post_ra>
// kernel: tpu_custom_call.1
= control target key start
LH: loop header
LB: loop body
LE: loop exit
PB: predicated region body
PF: predicated region fallthrough
CT: control target
= control target key end

     0   :  { %7 = vsyncpa [#allocation3], 0  ;;  %s1243_s0 = inlined_call_operand.hbm [shape: f32[2,8,8,128], index: 0, kind: input, shape index: {}]   ;;  %s1244_s1 = inlined_call_operand.hbm [shape: f32[2,48,128], index: 1, kind: input, shape index: {}]   ;;  %s1245_s2 = inlined_call_operand.vmem [shape: f32[2,8,1], index: 2, kind: output, shape index: {}]  }
   0x1   :  { %9 = vsyncpa [#allocation3 + $0x1], 0 }
   0x2   :  { %10 = vsyncpa [#allocation5], 0 }
   0x3   :  { %12 = vsyncpa [#allocation5 + $0x1], 0  ;;  %s907_s9 = smov 0   ;;  %s909_s10 = smov 0  }
   0x4   :  { %s911_s11 = smov 0   ;;  %s913_s12 = smov 0  }
   0x5 LB: > { %s926_s13 = sadd.s32 4294967295, %s885_s12   ;;  %s929_s14 = sadd.s32 1, %s885_s12   ;;  %s885_s12 = sphi %s913_s12, %s1255_s12   ;;  %s881_s11 = sphi %s911_s11, %s1254_s11   ;;  %s877_s10 = sphi %s909_s10, %s1253_s10   ;;  %s873_s9 = sphi %s907_s9, %s1252_s9  }
   0x6   : > { %s22_s15 = ssub.s32 %s885_s12, %s929_s14  ;;  %s25_s16 = sadd.s32 1, %s881_s11 }
   0x7   : > { %p23_p0 = scmp.eq.s32.totalorder %s22_s15, 0  ;;  %p32_p1 = scmp.ne.s32.totalorder %s881_s11, %s877_s10 }
   0x8   : > { %p33_p2 = scmp.eq.s32.totalorder %s885_s12, 0  ;;  %p38_p3 = scmp.ne.s32.totalorder %s877_s10, %s873_s9 }
   0x9   : > { %s939_s17 = scalar_select %p23_p0, %s881_s11, %s25_s16  }
   0xa   : > { %p34_p4 = por %p33_p2, %p32_p1  ;;  %p39_p5 = scmp.eq.s32.totalorder %s926_s13, 0 }
   0xb   : > { %p695_p6 = scmp.lt.s32.totalorder %s885_s12, 2  ;;  %s948_s19 = sand.u32 1, %s881_s11  }
   0xc   : > { %p943_p7 = por %p39_p5, %p38_p3  ;;  %s644_s20 = sshll.u32 %s948_s19, 6 }
   0xd   : > { %s653_s21 = sshll.u32 %s885_s12, 10  ;;  %s118_s25 = scalar_lea.vmem [#allocation2], %s644_s20 }
   0xe   : > { %s1247_s18 = scalar_select %p943_p7, 1, 0 }
   0xf   : > { %s955_s24 = scalar_lea.hbm %s1243_s0, %s653_s21  ;;  %s125_s26 = sshll.u32 %s118_s25, 4  ;;  %s957_s26 = int_to_ptr.vmem [resolvable:$true] %s125_s26 }
  0x10   : > { %p959_p8 = pnand %p695_p6, %p34_p4  ;;  %s115_s28 = scalar_lea.sflag [#allocation3], %s948_s19 }
  0x11   : > { %s787_s29 = scalar_lea.hbm %s955_s24, 1024  ;;  %s792_s4 = scalar_lea.hbm %s1243_s0, 2048 }
  0x12   : > { %p788_p10 = scmp.ne.s32.totalorder %s955_s24, %s787_s29  ;;  %p789_p11 = pneg %p959_p8 }
  0x13   : > { %p793_p0 = scmp.lt.u32.totalorder %s955_s24, %s1243_s0  ;;  %p794_p1 = scmp.lt.u32.totalorder %s792_s4, %s787_s29 }
  0x14   : > { %p790_p12 = pnand %p789_p11, %p788_p10  ;;  %p796_p3 = scmp.lt.u32.totalorder %s787_s29, %s955_s24 }
  0x15   : > { %p795_p2 = por %p794_p1, %p793_p0 }
  0x16   : > { %p791_p13 = pneg %p790_p12 }
  0x17   : > { %p797_p4 = por %p796_p3, %p795_p2 }
  0x19   : > { %p798_p5 = pnand %p797_p4, %p791_p13 }
  0x1b   : > { %801 = shalt.err (!%p798_p5)
}
  0x1c   : > { %s802_s7 = scalar_lea.vmem %s957_s26, 1024  ;;  %s887_s8 = smov [#allocation2]  }
  0x1d   : > { %p803_p6 = scmp.ne.s32.totalorder %s957_s26, %s802_s7  ;;  %s807_s9 = sshll.u32 %s887_s8, 4  ;;  %s808_s9 = int_to_ptr.vmem [resolvable:$false] %s807_s9 }
  0x1e   : > { %s809_s15 = scalar_lea.vmem %s808_s9, 2048  ;;  %p810_p9 = scmp.lt.s32.totalorder %s957_s26, %s808_s9 }
  0x1f   : > { %p805_p10 = pnand %p803_p6, %p789_p11  ;;  %p811_p0 = scmp.lt.s32.totalorder %s809_s15, %s802_s7 }
  0x21   : > { %p806_p12 = pneg %p805_p10  ;;  %p812_p1 = por %p811_p0, %p810_p9 }
  0x23   : > { %p813_p2 = pnand %p812_p1, %p806_p12 }
  0x25   : > { %816 = shalt.err (!%p813_p2)
}
  0x26   : > { %s888_s16 = smov 128   ;;  %s889_s20 = smov 8  }
  0x27   : > { %691 = dma.hbm_to_vmem [thread:$0]  (!%p959_p8), %s955_s24, 1024, %s957_s26, %s115_s28, %s888_s16, %s888_s16, %s889_s20  }
  0x28   : > { %p154_p9 = scmp.lt.s32.totalorder %s885_s12, 3  ;;  %s681_s21 = smul.u32 48, %s948_s19 }
  0x29   : > { %p1249_p13 = scmp.ge.s32.totalorder %s885_s12, 1  ;;  %s682_s23 = smul.u32 768, %s885_s12 }
  0x2a   : > { %s139_s3 = scalar_lea.vmem [#allocation4], %s681_s21  ;;  %s136_s24 = scalar_lea.sflag [#allocation5], %s948_s19 }
  0x2b   : > { %p999_p3 = pnand %p1249_p13, %p154_p9  ;;  %s1007_s30 = scalar_lea.hbm %s1244_s1, %s682_s23 }
  0x2c   : > { %s146_s4 = sshll.u32 %s139_s3, 4  ;;  %s817_s26 = scalar_lea.hbm %s1007_s30, 768  ;;  %s1009_s4 = int_to_ptr.vmem [resolvable:$true] %s146_s4 }
  0x2d   : > { %p818_p4 = scmp.ne.s32.totalorder %s1007_s30, %s817_s26  ;;  %s822_s5 = scalar_lea.hbm %s1244_s1, 1536 }
  0x2e   : > { %p823_p10 = scmp.lt.u32.totalorder %s1007_s30, %s1244_s1  ;;  %p824_p12 = scmp.lt.u32.totalorder %s822_s5, %s817_s26 }
  0x2f   : > { %p820_p5 = pnand %p818_p4, %p789_p11  ;;  %p826_p1 = scmp.lt.u32.totalorder %s817_s26, %s1007_s30 }
  0x30   : > { %p825_p0 = por %p824_p12, %p823_p10 }
  0x31   : > { %p821_p6 = pneg %p820_p5 }
  0x32   : > { %p827_p2 = por %p826_p1, %p825_p0 }
  0x34   : > { %p828_p9 = pnand %p827_p2, %p821_p6 }
  0x36   : > { %831 = shalt.err (!%p828_p9)
}
  0x37   : > { %s832_s8 = scalar_lea.vmem %s1009_s4, 768  ;;  %s890_s9 = smov [#allocation4]  }
  0x38   : > { %p833_p13 = scmp.ne.s32.totalorder %s1009_s4, %s832_s8  ;;  %s837_s15 = sshll.u32 %s890_s9, 4  ;;  %s838_s15 = int_to_ptr.vmem [resolvable:$false] %s837_s15 }
  0x39   : > { %s839_s21 = scalar_lea.vmem %s838_s15, 1536  ;;  %p840_p7 = scmp.lt.s32.totalorder %s1009_s4, %s838_s15 }
  0x3a   : > { %p835_p4 = pnand %p833_p13, %p789_p11  ;;  %p841_p10 = scmp.lt.s32.totalorder %s839_s21, %s832_s8 }
  0x3c   : > { %p836_p5 = pneg %p835_p4  ;;  %p842_p12 = por %p841_p10, %p840_p7 }
  0x3e   : > { %p843_p0 = pnand %p842_p12, %p836_p5 }
  0x40   : > { %846 = shalt.err (!%p843_p0)
}
  0x41   : > { %694 = dma.hbm_to_vmem [thread:$0]  (!%p959_p8), %s1007_s30, 768, %s1009_s4, %s136_s24, %s888_s16, %s888_s16, %s889_s20  }
  0x42   : > { %158 = sbr.rel (%p999_p3) target bundleno = 781 (0x30d), region = 28  ;;  %s160_s23 = sand.u32 (!%p999_p3), 1, %s877_s10  }
  0x43   : > { %s649_s25 = sshll.u32 (!%p999_p3), %s160_s23, 6  ;;  %s161_s29 = scalar_lea.sflag (!%p999_p3), [#allocation3], %s160_s23 }
  0x44   : > { %s1043_s3 = scalar_lea.vmem (!%p999_p3), [#allocation2], %s649_s25  ;;  %p1251_p7 = scmp.ne.s32.totalorder (!%p999_p3), %s1247_s18, 0 }
  0x49   : > { %864 = dma.done.wait (%p1251_p7), %s161_s29, 1024  }
  0x4a   : > { %866 = vsyncadd (%p1251_p7), %s161_s29, 4294966272  ;;  %s683_s19 = smul.u32 48, %s160_s23  ;;  %s170_s27 = scalar_lea.sflag [#allocation5], %s160_s23 }
  0x4c   : > { %s173_s26 = scalar_lea.vmem [#allocation4], %s683_s19 }
  0x4d   : > { %868 = dma.done.wait (%p1251_p7), %s170_s27, 768  }
  0x4e   : > { %870 = vsyncadd (%p1251_p7), %s170_s27, 4294966528  ;;  %v1053_v0 = vld [vmem:[%s173_s26 + $0x10] sm:$0xff]  ;;  %v1055_v1 = vld [vmem:[%s173_s26] sm:$0xff]  ;;  %s891_s18 = smov 120   ;;  %p198_p8 = scmp.lt.s32.totalorder %s926_s13, 1 }
  0x4f   : > { %v1057_v2 = vld [vmem:[%s173_s26 + $0x18] sm:$0xff]  ;;  %v315_v3 = vmul.f32 %v1053_v0, %v1053_v0  ;;  %v313_v4 = vmul.f32 %v1055_v1, %v1055_v1  ;;  %v1063_v5 = vld [vmem:[%s173_s26 + $0x8] sm:$0xff]  ;;  %v1071_v9 = vld [vmem:[%s173_s26 + $0x20] sm:$0xff] }
  0x50   : > { %v316_v6 = vmul.f32 %v1057_v2, %v1057_v2  ;;  %v314_v7 = vmul.f32 %v1063_v5, %v1063_v5  ;;  %v1069_v8 = vld [vmem:[%s173_s26 + $0x28] sm:$0xff]  ;;  %v317_v11 = vmul.f32 %v1071_v9, %v1071_v9  ;;  %v1081_v13 = vld [vmem:[%s1043_s3] sm:$0xff]  ;;  %v1091_v17 = vld [vmem:[%s1043_s3 + $0x10] sm:$0xff]  ;;  %s1257_s13 = smov (!%p198_p8, %s926_s13), 1 }
  0x51   : > { %323 = vadd.xlane.f32.xlu1 %v315_v3  ;;  %319 = vadd.xlane.f32.xlu0 %v313_v4  ;;  %v318_v10 = vmul.f32 %v1069_v8, %v1069_v8  ;;  %v1078_v12 = vld [vmem:[%s1043_s3 + $0x8] sm:$0xff]  ;;  %v217_v15 = vmul.f32 %v1081_v13, %v1081_v13  ;;  %v1088_v16 = vld [vmem:[%s1043_s3 + $0x18] sm:$0xff]  ;;  %v219_v19 = vmul.f32 %v1091_v17, %v1091_v17  ;;  %v1101_v21 = vld [vmem:[%s1043_s3 + $0x20] sm:$0xff]  ;;  %s650_s16 = sshll.u32 %s1257_s13, 3 }
  0x52   : > { %v218_v14 = vmul.f32 %v1078_v12, %v1078_v12  ;;  %v220_v18 = vmul.f32 %v1088_v16, %v1088_v16  ;;  %v1098_v20 = vld [vmem:[%s1043_s3 + $0x28] sm:$0xff]  ;;  %v221_v23 = vmul.f32 %v1101_v21, %v1101_v21  ;;  %v1108_v24 = vld [vmem:[%s1043_s3 + $0x38] sm:$0xff]  ;;  %v1111_v25 = vld [vmem:[%s1043_s3 + $0x30] sm:$0xff]  ;;  %s201_s30 = scalar_lea.vmem %s1245_s2, %s650_s16 }
  0x53   : > { %v222_v22 = vmul.f32 %v1098_v20, %v1098_v20  ;;  %v224_v26 = vmul.f32 %v1108_v24, %v1108_v24  ;;  %v223_v27 = vmul.f32 %v1111_v25, %v1111_v25 }
  0x55   : > { %325 = vadd.xlane.f32.xlu1 %v316_v6  ;;  %321 = vadd.xlane.f32.xlu0 %v314_v7 }
  0x59   : > { %329 = vadd.xlane.f32.xlu1 %v318_v10  ;;  %327 = vadd.xlane.f32.xlu0 %v317_v11 }
  0x5d   : > { %227 = vadd.xlane.f32.xlu1 %v218_v14  ;;  %225 = vadd.xlane.f32.xlu0 %v217_v15 }
  0x61   : > { %231 = vadd.xlane.f32.xlu1 %v220_v18  ;;  %229 = vadd.xlane.f32.xlu0 %v219_v19 }
  0x65   : > { %235 = vadd.xlane.f32.xlu1 %v222_v22  ;;  %233 = vadd.xlane.f32.xlu0 %v221_v23 }
  0x69   : > { %239 = vadd.xlane.f32.xlu1 %v224_v26  ;;  %237 = vadd.xlane.f32.xlu0 %v223_v27 }
  0xde   : > { %v324_v28 = vpop.xlane.xlu1 %323  ;;  %v320_v29 = vpop.xlane.xlu0 %319 }
  0xdf   : > { %731 = vrsqrt.f32 %v324_v28  ;;  %vm347_vm0 = vcmp.eq.f32.partialorder %v324_v28, inf  ;;  %vm349_vm1 = vcmp.eq.f32.partialorder %v324_v28, 0.0  ;;  %v350_v39 = vand.u32 2147483648, %v324_v28 }
  0xe0   : > { %733 = vrsqrt.f32 %v320_v29  ;;  %vm333_vm2 = vcmp.eq.f32.partialorder %v320_v29, inf  ;;  %v336_v42 = vand.u32 2147483648, %v320_v29  ;;  %vm335_vm3 = vcmp.eq.f32.partialorder %v320_v29, 0.0 }
  0xe2   : > { %v326_v30 = vpop.xlane.xlu1 %325  ;;  %v322_v31 = vpop.xlane.xlu0 %321 }
  0xe3   : > { %735 = vrsqrt.f32 %v326_v30  ;;  %vm354_vm4 = vcmp.eq.f32.partialorder %v326_v30, inf  ;;  %vm356_vm5 = vcmp.eq.f32.partialorder %v326_v30, 0.0  ;;  %v357_v51 = vand.u32 2147483648, %v326_v30 }
  0xe4   : > { %737 = vrsqrt.f32 %v322_v31  ;;  %vm340_vm6 = vcmp.eq.f32.partialorder %v322_v31, inf  ;;  %v343_v54 = vand.u32 2147483648, %v322_v31  ;;  %vm342_vm7 = vcmp.eq.f32.partialorder %v322_v31, 0.0 }
  0xe6   : > { %v330_v32 = vpop.xlane.xlu1 %329  ;;  %v1117_v33 = vpop.xlane.xlu0 %327 }
  0xe7   : > { %739 = vrsqrt.f32 %v330_v32  ;;  %vm368_vm8 = vcmp.eq.f32.partialorder %v330_v32, inf  ;;  %vm370_vm9 = vcmp.eq.f32.partialorder %v330_v32, 0.0  ;;  %v371_v63 = vand.u32 2147483648, %v330_v32 }
  0xe8   : > { %741 = vrsqrt.f32 %v1117_v33  ;;  %vm361_vm10 = vcmp.eq.f32.partialorder %v1117_v33, inf  ;;  %v364_v6 = vand.u32 2147483648, %v1117_v33  ;;  %vm363_vm11 = vcmp.eq.f32.partialorder %v1117_v33, 0.0 }
  0xe9   : > { %v732_v34 = vpop.eup %731 }
  0xea   : > { %v734_v35 = vpop.eup %733  ;;  %v346_v36 = vmul.f32 %v732_v34, %v324_v28  ;;  %v1120_v37 = vpop.xlane.xlu1 %227 }
  0xeb   : > { %v1122_v38 = vpop.xlane.xlu0 %225  ;;  %v332_v40 = vmul.f32 %v734_v35, %v320_v29  ;;  %743 = vrsqrt.f32 %v1120_v37  ;;  %vm250_vm12 = vcmp.eq.f32.partialorder %v1120_v37, inf  ;;  %v253_v23 = vand.u32 2147483648, %v1120_v37 }
  0xec   : > { %v348_v41 = vsel %vm347_vm0, %v324_v28, %v346_v36  ;;  %745 = vrsqrt.f32 %v1122_v38  ;;  %vm243_vm13 = vcmp.eq.f32.partialorder %v1122_v38, inf  ;;  %vm252_vm14 = vcmp.eq.f32.partialorder %v1120_v37, 0.0 }
  0xed   : > { %v736_v43 = vpop.eup %735  ;;  %v351_v44 = vsel %vm349_vm1, %v350_v39, %v348_v41  ;;  %v334_v45 = vsel %vm333_vm2, %v320_v29, %v332_v40  ;;  %v246_v29 = vand.u32 2147483648, %v1122_v38  ;;  %vm245_vm15 = vcmp.eq.f32.partialorder %v1122_v38, 0.0 }
  0xee   : > { %v738_v46 = vpop.eup %737  ;;  %747 = vrsqrt.f32 %v351_v44  ;;  %v337_v47 = vsel %vm335_vm3, %v336_v42, %v334_v45  ;;  %v353_v48 = vmul.f32 %v736_v43, %v326_v30  ;;  %v1126_v49 = vpop.xlane.xlu1 %231 }
  0xef   : > { %v1128_v50 = vpop.xlane.xlu0 %229  ;;  %749 = vrsqrt.f32 %v337_v47  ;;  %v339_v52 = vmul.f32 %v738_v46, %v322_v31  ;;  %vm264_vm0 = vcmp.eq.f32.partialorder %v1126_v49, inf  ;;  %vm266_vm1 = vcmp.eq.f32.partialorder %v1126_v49, 0.0 }
  0xf0   : > { %v355_v53 = vsel %vm354_vm4, %v326_v30, %v353_v48  ;;  %751 = vrsqrt.f32 %v1126_v49  ;;  %v267_v39 = vand.u32 2147483648, %v1126_v49  ;;  %vm257_vm2 = vcmp.eq.f32.partialorder %v1128_v50, inf }
  0xf1   : > { %v740_v55 = vpop.eup %739  ;;  %v358_v56 = vsel %vm356_vm5, %v357_v51, %v355_v53  ;;  %v341_v57 = vsel %vm340_vm6, %v322_v31, %v339_v52  ;;  %753 = vrsqrt.f32 %v1128_v50  ;;  %vm259_vm3 = vcmp.eq.f32.partialorder %v1128_v50, 0.0 }
  0xf2   : > { %v742_v58 = vpop.eup %741  ;;  %755 = vrsqrt.f32 %v358_v56  ;;  %v344_v59 = vsel %vm342_vm7, %v343_v54, %v341_v57  ;;  %v367_v60 = vmul.f32 %v740_v55, %v330_v32  ;;  %v1132_v61 = vpop.xlane.xlu1 %235  ;;  %v260_v40 = vand.u32 2147483648, %v1128_v50 }
  0xf3   : > { %v1134_v62 = vpop.xlane.xlu0 %233  ;;  %757 = vrsqrt.f32 %v344_v59  ;;  %v360_v3 = vmul.f32 %v742_v58, %v1117_v33  ;;  %vm278_vm4 = vcmp.eq.f32.partialorder %v1132_v61, inf  ;;  %vm280_vm5 = vcmp.eq.f32.partialorder %v1132_v61, 0.0 }
  0xf4   : > { %v369_v4 = vsel %vm368_vm8, %v330_v32, %v367_v60  ;;  %759 = vrsqrt.f32 %v1132_v61  ;;  %v281_v43 = vand.u32 2147483648, %v1132_v61  ;;  %vm271_vm6 = vcmp.eq.f32.partialorder %v1134_v62, inf }
  0xf5   : > { %v744_v7 = vpop.eup %743  ;;  %v372_v10 = vsel %vm370_vm9, %v371_v63, %v369_v4  ;;  %v362_v11 = vsel %vm361_vm10, %v1117_v33, %v360_v3  ;;  %761 = vrsqrt.f32 %v1134_v62  ;;  %vm273_vm7 = vcmp.eq.f32.partialorder %v1134_v62, 0.0 }
  0xf6   : > { %v746_v14 = vpop.eup %745  ;;  %763 = vrsqrt.f32 %v372_v10  ;;  %v365_v15 = vsel %vm363_vm11, %v364_v6, %v362_v11  ;;  %v249_v18 = vmul.f32 %v744_v7, %v1120_v37  ;;  %v1144_v19 = vpop.xlane.xlu1 %239  ;;  %v274_v56 = vand.u32 2147483648, %v1134_v62 }
  0xf7   : > { %v1146_v22 = vpop.xlane.xlu0 %237  ;;  %765 = vrsqrt.f32 %v365_v15  ;;  %v242_v26 = vmul.f32 %v746_v14, %v1122_v38  ;;  %vm292_vm8 = vcmp.eq.f32.partialorder %v1144_v19, inf  ;;  %vm294_vm9 = vcmp.eq.f32.partialorder %v1144_v19, 0.0 }
  0xf8   : > { %v748_v27 = vpop.eup %747  ;;  %v251_v28 = vsel %vm250_vm12, %v1120_v37, %v249_v18  ;;  %767 = vrsqrt.f32 %v1144_v19  ;;  %v295_v3 = vand.u32 2147483648, %v1144_v19  ;;  %vm285_vm10 = vcmp.eq.f32.partialorder %v1146_v22, inf }
  0xf9   : > { %v750_v30 = vpop.eup %749  ;;  %v244_v31 = vsel %vm243_vm13, %v1122_v38, %v242_v26  ;;  %769 = vrsqrt.f32 %v1146_v22  ;;  %v254_v34 = vsel %vm252_vm14, %v253_v23, %v251_v28  ;;  %vm287_vm11 = vcmp.eq.f32.partialorder %v1146_v22, 0.0 }
  0xfa   : > { %v752_v32 = vpop.eup %751  ;;  %v247_v33 = vsel %vm245_vm15, %v246_v29, %v244_v31  ;;  %v379_v46 = vmul.f32 %v750_v30, %v1055_v1  ;;  %v288_v10 = vand.u32 2147483648, %v1146_v22  ;;  %vm457_vm12 = vcmask 392192  }
  0xfb   : > { %v754_v35 = vpop.eup %753  ;;  %v263_v36 = vmul.f32 %v752_v32, %v1126_v49  ;;  %771 = vrsqrt.f32 %v247_v33  ;;  %vm522_vm13 = vcmask 1041409   ;;  %vm524_vm14 = vcmask 1042434  }
  0xfc   : > { %v756_v37 = vpop.eup %755  ;;  %v256_v38 = vmul.f32 %v754_v35, %v1128_v50  ;;  %773 = vrsqrt.f32 %v254_v34  ;;  %vm526_vm15 = vcmask 1043459  }
  0xfd   : > { %v758_v41 = vpop.eup %757  ;;  %v265_v42 = vsel %vm264_vm0, %v1126_v49, %v263_v36  ;;  %v382_v48 = vmul.f32 %v756_v37, %v1057_v2  ;;  %vm528_vm0 = vcmask 1044484  }
  0xfe   : > { %v760_v44 = vpop.eup %759  ;;  %v258_v45 = vsel %vm257_vm2, %v1128_v50, %v256_v38  ;;  %v380_v47 = vmul.f32 %v758_v41, %v1063_v5  ;;  %v268_v52 = vsel %vm266_vm1, %v267_v39, %v265_v42  ;;  %v381_v5 = vmul.f32 %v748_v27, %v1053_v0 }
  0xff   : > { %v762_v51 = vpop.eup %761  ;;  %v277_v53 = vmul.f32 %v760_v44, %v1132_v61  ;;  %v261_v2 = vsel %vm259_vm3, %v260_v40, %v258_v45  ;;  %775 = vrsqrt.f32 %v268_v52  ;;  %vm530_vm1 = vcmask 1045509  }
 0x100   : > { %v764_v54 = vpop.eup %763  ;;  %v270_v55 = vmul.f32 %v762_v51, %v1134_v62  ;;  %v389_v1 = vpack.c.bf16 %v380_v47, %v379_v46  ;;  %v390_v60 = vpack.c.bf16 %v382_v48, %v381_v5  ;;  %vm532_vm2 = vcmask 1046534  }
 0x101   : > { %v766_v57 = vpop.eup %765  ;;  %v279_v49 = vsel %vm278_vm4, %v1132_v61, %v277_v53  ;;  %vm534_vm3 = vcmask 1047559   ;;  %vm537_vm4 = vcmask 64512  }
 0x102   : > { %v768_v58 = vpop.eup %767  ;;  %v272_v59 = vsel %vm271_vm6, %v1134_v62, %v270_v55  ;;  %661 = vmatprep.subr.bf16.mxu0 %v389_v1  ;;  %675 = vmatprep.subr.bf16.mxu1 %v389_v1  ;;  %v282_v0 = vsel %vm280_vm5, %v281_v43, %v279_v49  ;;  %v384_v62 = vmul.f32 %v764_v54, %v1069_v8  ;;  %vm545_vm5 = vcmask 326656  }
 0x103   : > { %v770_v50 = vpop.eup %769  ;;  %v291_v63 = vmul.f32 %v768_v58, %v1144_v19  ;;  %662 = vmatpush3.bf16.xpose.msra.mxu0 %v389_v1  ;;  %678 = vmatpush3.bf16.xpose.msra.mxu1 %v389_v1  ;;  %v275_v4 = vsel %vm273_vm7, %v274_v56, %v272_v59  ;;  %777 = vrsqrt.f32 %v282_v0  ;;  %v383_v23 = vmul.f32 %v766_v57, %v1071_v9 }
 0x104   : > { %v284_v6 = vmul.f32 %v770_v50, %v1146_v22  ;;  %663 = vmatprep.subr.bf16.mxu0 %v390_v60  ;;  %676 = vmatprep.subr.bf16.mxu1 %v390_v60  ;;  %779 = vrsqrt.f32 %v275_v4  ;;  %vm551_vm6 = vcmask 7168  }
 0x105   : > { %v772_v61 = vpop.eup %771  ;;  %781 = vrsqrt.f32 %v261_v2  ;;  %v293_v7 = vsel %vm292_vm8, %v1144_v19, %v291_v63  ;;  %v391_v29 = vpack.c.bf16 %v384_v62, %v383_v23 }
 0x106   : > { %v774_v11 = vpop.eup %773  ;;  %v296_v14 = vsel %vm294_vm9, %v295_v3, %v293_v7  ;;  %v286_v15 = vsel %vm285_vm10, %v1146_v22, %v284_v6  ;;  %v305_v18 = vmul.f32 %v772_v61, %v1081_v13 }
 0x107   : > { %783 = vrsqrt.f32 %v296_v14  ;;  %v289_v26 = vsel %vm287_vm11, %v288_v10, %v286_v15  ;;  %v306_v27 = vmul.f32 %v774_v11, %v1078_v12 }
 0x108   : > { %785 = vrsqrt.f32 %v289_v26 }
 0x109   : > { %v385_v28 = vpack.c.bf16 %v306_v27, %v305_v18  ;;  %v776_v8 = vpop.eup %775 }
 0x10a   : > { %v308_v34 = vmul.f32 %v776_v8, %v1088_v16 }
 0x10b   : > { %667 = vmatprep.mubr.bf16.mxu0 %v385_v28  ;;  %664 = vmatpush3.bf16.xpose.msra.mxu0 %v390_v60 }
 0x10c   : > { %679 = vmatpush3.bf16.xpose.msra.mxu1 %v390_v60  ;;  %665 = vmatprep.subr.bf16.mxu0 %v391_v29 }
 0x10d   : > { %v778_v19 = vpop.eup %777  ;;  %677 = vmatprep.subr.bf16.mxu1 %v391_v29 }
 0x10e   : > { %v780_v30 = vpop.eup %779  ;;  %v310_v22 = vmul.f32 %v778_v19, %v1098_v20 }
 0x10f   : > { %v782_v13 = vpop.eup %781  ;;  %v309_v9 = vmul.f32 %v780_v30, %v1101_v21 }
 0x110   : > { %v307_v12 = vmul.f32 %v782_v13, %v1091_v17 }
 0x111   : > { %v784_v31 = vpop.eup %783  ;;  %v387_v32 = vpack.c.bf16 %v310_v22, %v309_v9 }
 0x112   : > { %v786_v33 = vpop.eup %785  ;;  %v312_v36 = vmul.f32 %v784_v31, %v1108_v24  ;;  %v386_v39 = vpack.c.bf16 %v308_v34, %v307_v12 }
 0x113   : > { %671 = vmatprep.mubr.bf16.mxu1 %v387_v32  ;;  %666 = vmatpush3.bf16.xpose.msra.mxu0 %v391_v29  ;;  %v311_v35 = vmul.f32 %v786_v33, %v1111_v25 }
 0x114   : > { %680 = vmatpush3.bf16.xpose.msra.mxu1 %v391_v29 }
 0x115   : > { %v388_v37 = vpack.c.bf16 %v312_v36, %v311_v35 }
 0x11a   : > { %668 = vmatmul.mubr.bf16.vlgmr.msra.gmra.mrb[0].mxu0 %v386_v39 }
 0x11b   : > { %672 = vmatmul.mubr.bf16.vlgmr.msra.gmra.mrb[0].mxu1 %v388_v37 }
 0x1ed   : > { %v669_v20 = vpop.f32.mrb[0].mxu0 }
 0x1ee   : > { %v472_v21 = vsel %vm457_vm12, %v669_v20, -inf  ;;  %v673_v38 = vpop.f32.mrb[0].mxu1  ;;  %v426_v40 = vpop.f32.mrb[1].mxu0 }
 0x1ef   : > { %v473_v41 = vrot.slane %v472_v21, 4  ;;  %v500_v42 = vsel %vm457_vm12, %v673_v38, -inf  ;;  %v458_v17 = vsel %vm457_vm12, %v426_v40, -inf  ;;  %v442_v16 = vpop.f32.mrb[1].mxu1  ;;  %v670_v43 = vpop.f32.mrb[2].mxu0 }
 0x1f0   : > { %v501_v25 = vrot.slane %v500_v42, 4  ;;  %v459_v44 = vrot.slane %v458_v17, 4  ;;  %v486_v24 = vsel %vm457_vm12, %v442_v16, -inf  ;;  %v479_v45 = vsel %vm457_vm12, %v670_v43, -inf  ;;  %v674_v46 = vpop.f32.mrb[2].mxu1  ;;  %v429_v47 = vpop.f32.mrb[3].mxu0 }
 0x1f1   : > { %v474_v48 = vmax.f32 %v472_v21, %v473_v41  ;;  %v487_v51 = vrot.slane %v486_v24, 4  ;;  %v480_v52 = vrot.slane %v479_v45, 4  ;;  %v507_v53 = vsel %vm457_vm12, %v674_v46, -inf  ;;  %v445_v54 = vpop.f32.mrb[3].mxu1 }
 0x1f2   : > { %v502_v55 = vmax.f32 %v500_v42, %v501_v25  ;;  %v460_v56 = vmax.f32 %v458_v17, %v459_v44  ;;  %v508_v1 = vrot.slane %v507_v53, 4  ;;  %v465_v5 = vsel %vm457_vm12, %v429_v47, -inf }
 0x1f3   : > { %v475_v57 = vrot.slane %v474_v48, 2  ;;  %v488_v2 = vmax.f32 %v486_v24, %v487_v51  ;;  %v481_v49 = vmax.f32 %v479_v45, %v480_v52  ;;  %v466_v58 = vrot.slane %v465_v5, 4 }
 0x1f4   : > { %v461_v59 = vrot.slane %v460_v56, 2  ;;  %v509_v60 = vmax.f32 %v507_v53, %v508_v1  ;;  %v493_v0 = vsel %vm457_vm12, %v445_v54, -inf  ;;  %v503_v6 = vrot.slane %v502_v55, 2 }
 0x1f5   : > { %v489_v50 = vrot.slane %v488_v2, 2  ;;  %v482_v63 = vrot.slane %v481_v49, 2  ;;  %v467_v3 = vmax.f32 %v465_v5, %v466_v58  ;;  %v476_v4 = vmax.f32 %v474_v48, %v475_v57 }
 0x1f6   : > { %v462_v61 = vmax.f32 %v460_v56, %v461_v59  ;;  %v494_v7 = vrot.slane %v493_v0, 4  ;;  %v510_v62 = vrot.slane %v509_v60, 2  ;;  %v504_v27 = vmax.f32 %v502_v55, %v503_v6 }
 0x1f7   : > { %v483_v10 = vmax.f32 %v481_v49, %v482_v63  ;;  %v468_v11 = vrot.slane %v467_v3, 2  ;;  %v490_v14 = vmax.f32 %v488_v2, %v489_v50  ;;  %v477_v26 = vrot.slane %v476_v4, 1 }
 0x1f8   : > { %v495_v15 = vmax.f32 %v493_v0, %v494_v7  ;;  %v463_v18 = vrot.slane %v462_v61, 1  ;;  %v511_v8 = vmax.f32 %v509_v60, %v510_v62  ;;  %v505_v32 = vrot.slane %v504_v27, 1 }
 0x1f9   : > { %v469_v23 = vmax.f32 %v467_v3, %v468_v11  ;;  %v484_v29 = vrot.slane %v483_v10, 1  ;;  %v491_v30 = vrot.slane %v490_v14, 1  ;;  %v478_v31 = vmax.f32 %v476_v4, %v477_v26 }
 0x1fa   : > { %v496_v28 = vrot.slane %v495_v15, 2  ;;  %v464_v13 = vmax.f32 %v462_v61, %v463_v18  ;;  %v512_v34 = vrot.slane %v511_v8, 1  ;;  %v506_v21 = vmax.f32 %v504_v27, %v505_v32 }
 0x1fb   : > { %v470_v19 = vrot.slane %v469_v23, 1  ;;  %v485_v12 = vmax.f32 %v483_v10, %v484_v29  ;;  %v492_v36 = vmax.f32 %v490_v14, %v491_v30 }
 0x1fc   : > { %v497_v22 = vmax.f32 %v495_v15, %v496_v28  ;;  %v513_v40 = vmax.f32 %v511_v8, %v512_v34 }
 0x1fd   : > { %v471_v9 = vmax.f32 %v469_v23, %v470_v19 }
 0x1fe   : > { %v498_v33 = vrot.slane %v497_v22, 1 }
 0x1ff   : > { %v523_v35 = vsel %vm522_vm13, %v471_v9, %v464_v13 }
 0x200   : > { %v525_v39 = vsel %vm524_vm14, %v478_v31, %v523_v35  ;;  %v499_v37 = vmax.f32 %v497_v22, %v498_v33 }
 0x201   : > { %v527_v20 = vsel %vm526_vm15, %v485_v12, %v525_v39 }
 0x202   : > { %v529_v38 = vsel %vm528_vm0, %v492_v36, %v527_v20 }
 0x203   : > { %v531_v41 = vsel %vm530_vm1, %v499_v37, %v529_v38 }
 0x204   : > { %v533_v42 = vsel %vm532_vm2, %v506_v21, %v531_v41 }
 0x205   : > { %v535_v17 = vsel %vm534_vm3, %v513_v40, %v533_v42 }
 0x206   : > { %542 = vrot.lane.b32.xlu0 %v535_v17, %s891_s18  ;;  %v538_v16 = vsel %vm537_vm4, %v535_v17, 0.0 }
 0x207   : > { %539 = vadd.xlane.f32.xlu1 %v538_v16 }
 0x278   : > { %v543_v43 = vpop.permute.xlu0 %542 }
 0x279   : > { %v546_v25 = vsel %vm545_vm5, %v543_v43, 0.0 }
 0x27a   : > { %547 = vadd.xlane.f32.xlu1 %v546_v25 }
 0x294   : > { %v540_v44 = vpop.xlane.xlu1 %539 }
 0x295   : > { %v541_v45 = vmul.f32 0.125, %v540_v44 }
 0x307   : > { %v548_v24 = vpop.xlane.xlu1 %547 }
 0x308   : > { %v549_v46 = vmul.f32 0.025, %v548_v24 }
 0x30a   : > { %v550_v47 = vadd.f32 %v549_v46, %v541_v45 }
 0x30c   : > { %552 = vst.msk [vmem:[%s201_s30] sm:$0xff] %vm551_vm6, %v550_v47 }
 0x30d PF: > { %p15_p11 = scmp.ge.s32.totalorder %s929_s14, 4   ;;  %s1252_s9 = smov %s877_s10 }
 0x30e   : > { %s1253_s10 = smov %s881_s11  ;;  %s1254_s11 = smov %s939_s17 }
 0x30f   : > { %s1255_s12 = smov %s929_s14  ;;  %17 = sbr.rel (!%p15_p11) target bundleno = 5 (0x5), region = 81 }
 0x316   :  { %572 = vsyncpa [#allocation3], 1 }
 0x317   :  { %574 = vsyncpa [#allocation3 + $0x1], 1 }
 0x318   :  { %575 = vsyncpa [#allocation5], 1 }
 0x319   :  { %577 = vsyncpa [#allocation5 + $0x1], 1 }

</bundles_post_ra>
